<compile_context>
chip_gen: v7x
topology: tpu7x:2x2x1
jax: 0.10.0
libtpu: 0.0.40
codegen_flags: <defaults>
</compile_context>

<pallas_src>
import functools

import jax
import jax.numpy as jnp
from jax.experimental import pallas as pl
from jax.experimental.pallas import tpu as pltpu


def _round_up(x, m):
    return ((x + m - 1) // m) * m


# ---------------------------------------------------------------------------
# Kernel: one MXU matmul tile (bf16/f32 in, f32 accumulate) + bias epilogue.
# ---------------------------------------------------------------------------
def _fused_head_kernel(x_ref, w_ref, b_ref, o_ref):
    acc = jnp.dot(x_ref[...], w_ref[...], preferred_element_type=jnp.float32)
    o_ref[...] = acc + b_ref[...]


def _pick_batch_tiling(n):
    """Bucketed padded-batch size and row tile.

    Keeps the number of distinct Mosaic kernel shapes small (no recompile per
    batch size) while still using >=256-row tiles once the batch is large.
    """
    if n <= 128:
        return 128, 128
    if n <= 512:
        n_pad = _round_up(n, 128)
        return n_pad, n_pad
    return _round_up(n, 512), 512


@functools.partial(jax.jit, static_argnames=("num_classes", "tile_nc"))
def _classifier_forward(x, w_pad, b_pad, *, num_classes, tile_nc):
    """Whole forward path in one executable.

    x:     [N, C, 1, 1] float32 (NCHW)
    w_pad: [C, ncols]   compute dtype (fused, lane-padded head weights)
    b_pad: [1, ncols]   float32     (fused, lane-padded biases)
    Returns a list of per-head logits, each [N, num_classes[i]] float32.
    """
    n, c = x.shape[0], x.shape[1]
    ncols = w_pad.shape[1]
    n_pad, tile_n = _pick_batch_tiling(n)

    # NCHW -> [N, C]; cast + (fused) zero-pad the batch to the bucket.
    x_flat = x.reshape(n, c).astype(w_pad.dtype)
    if n_pad != n:
        x_flat = jnp.pad(x_flat, ((0, n_pad - n), (0, 0)))

    out_pad = pl.pallas_call(
        _fused_head_kernel,
        out_shape=jax.ShapeDtypeStruct((n_pad, ncols), jnp.float32),
        grid=(n_pad // tile_n, ncols // tile_nc),
        in_specs=[
            pl.BlockSpec((tile_n, c), lambda i, j: (i, 0)),    # activations
            pl.BlockSpec((c, tile_nc), lambda i, j: (0, j)),   # fused weights
            pl.BlockSpec((1, tile_nc), lambda i, j: (0, j)),   # fused bias
        ],
        out_specs=pl.BlockSpec((tile_n, tile_nc), lambda i, j: (i, j)),
        compiler_params=pltpu.CompilerParams(
            # Both axes write independent output tiles: shard across the two
            # TensorCores on v7x (rows and/or columns); no-op on v5e/v6e.
            dimension_semantics=("parallel", "parallel")),
    )(x_flat, w_pad, b_pad)

    # Drop the batch padding and split the fused column dim back into heads.
    out = out_pad[:n]
    logits = []
    off = 0
    for nc in num_classes:
        logits.append(out[:, off:off + nc])
        off += nc
    return logits


class ClassifierPallas:
    """JAX/Pallas port of Classifier.forward for the 'vgg19' backbone config.

    cfg.global_pool == 'AVG' -> expand = 1 -> in_channels = 512.
    All fc_<i> heads are fused into a single weight matrix so the whole
    forward pass is ONE pallas_call (inside one jitted executable) regardless
    of the number of heads.
    """

    MAX_TILE_NC = 512   # column tile cap (lane-dense multiple of 128)

    def __init__(self, num_classes, in_channels=512, seed=0,
                 compute_dtype=jnp.bfloat16):
        self.num_classes = tuple(int(nc) for nc in num_classes)
        self.in_channels = int(in_channels)
        self.total_nc = sum(self.num_classes)
        self.compute_dtype = compute_dtype

        # Lane-dense fused output width; if wide, pad to a multiple of the
        # column tile so the ncols grid axis divides evenly.
        ncols = _round_up(max(self.total_nc, 1), 128)
        if ncols > self.MAX_TILE_NC:
            ncols = _round_up(ncols, self.MAX_TILE_NC)
            self.tile_nc = self.MAX_TILE_NC
        else:
            self.tile_nc = ncols
        self.ncols = ncols

        key = jax.random.PRNGKey(seed)
        blocks = []
        for nc in self.num_classes:
            key, wk = jax.random.split(key)
            # PyTorch: conv weight [nc, C, 1, 1] ~ N(0, 0.01), bias zeroed.
            w_conv = 0.01 * jax.random.normal(
                wk, (nc, self.in_channels), dtype=jnp.float32)
            blocks.append(jnp.transpose(w_conv))          # [C, nc] for x @ w

        w_cat = jnp.concatenate(blocks, axis=1)           # [C, total_nc] f32
        self.w_cat_f32 = w_cat                            # for reference check

        # Fused, lane-padded parameters used by the kernel.
        self.w_pad = jnp.pad(
            w_cat, ((0, 0), (0, self.ncols - self.total_nc))
        ).astype(compute_dtype)
        # PyTorch zero-inits the biases; padded columns stay zero too.
        self.b_pad = jnp.zeros((1, self.ncols), dtype=jnp.float32)

    def forward(self, x):
        """x: [N, C, 1, 1] float32 (NCHW). Returns (logits, logit_maps)."""
        n, c, h, w_sp = x.shape
        assert c == self.in_channels and h == 1 and w_sp == 1
        logit_maps = []                                   # forward() never fills it
        if n == 0:                                        # zero-size grid guard
            return ([jnp.zeros((0, nc), jnp.float32) for nc in self.num_classes],
                    logit_maps)
        logits = _classifier_forward(
            x, self.w_pad, self.b_pad,
            num_classes=self.num_classes, tile_nc=self.tile_nc)
        return logits, logit_maps


# ---------------------------------------------------------------------------
# Plain-JAX references for the correctness check.
# ---------------------------------------------------------------------------
def _reference_forward_f32(x, model):
    """Full-f32 reference of the same math (bias is zero-init)."""
    n, c, _, _ = x.shape
    out = x.reshape(n, c) @ model.w_cat_f32
    logits, off = [], 0
    for nc in model.num_classes:
        logits.append(out[:, off:off + nc])
        off += nc
    return logits


def _reference_forward_matched(x, model):
    """Reference matched to kernel precision (compute_dtype in, f32 acc)."""
    n, c, _, _ = x.shape
    x_flat = x.reshape(n, c).astype(model.compute_dtype)
    w = model.w_cat_f32.astype(model.compute_dtype)
    out = jnp.dot(x_flat, w, preferred_element_type=jnp.float32)
    logits, off = [], 0
    for nc in model.num_classes:
        logits.append(out[:, off:off + nc])
        off += nc
    return logits


if __name__ == "__main__":
    # vgg backbone + AVG pooling -> x has 512 channels and 1x1 spatial.
    num_classes = [3, 5]          # cfg.num_classes
    channels = 512                # 512 * expand, expand = 1

    model = ClassifierPallas(num_classes, in_channels=channels, seed=0)

    key = jax.random.PRNGKey(0)
    # Two batch sizes hit the same bucketed kernel shape (128 padded rows),
    # exercising the pad + unpad path without an extra Mosaic compile.
    for batch in (2, 9):
        key, xk = jax.random.split(key)
        x = jax.random.normal(xk, (batch, channels, 1, 1), dtype=jnp.float32)

        logits, logit_maps = model.forward(x)
        logits = [jax.block_until_ready(l) for l in logits]

        refs_matched = _reference_forward_matched(x, model)   # tight check
        refs_f32 = _reference_forward_f32(x, model)           # loose (bf16 rounding)
        for got, ref_m, ref_f, nc in zip(logits, refs_matched, refs_f32,
                                         num_classes):
            assert got.shape == (batch, nc), got.shape
            assert jnp.allclose(got, ref_m, atol=1e-5, rtol=1e-5)
            assert jnp.allclose(got, ref_f, atol=5e-3, rtol=5e-2)
        assert logit_maps == []

    # Empty-batch guard (no kernel launch).
    z_logits, z_maps = model.forward(jnp.zeros((0, channels, 1, 1), jnp.float32))
    assert all(l.shape == (0, nc) for l, nc in zip(z_logits, num_classes))
    assert z_maps == []

    # TODO(synk): bn_<i> (BatchNorm2d) and attention_map are constructed by
    # Classifier.__init__ but unused in forward(); not implemented here.
    print("KERNEL_OK")
</pallas_src>

<mosaic_0001>
module attributes {stable_mosaic.version = 11 : i64} {
  func.func @_fused_head_kernel(%arg0: i32, %arg1: i32, %arg2: memref<128x512xbf16, #tpu.memory_space<vmem>>, %arg3: memref<512x128xbf16, #tpu.memory_space<vmem>>, %arg4: memref<1x128xf32, #tpu.memory_space<vmem>>, %arg5: memref<128x128xf32, #tpu.memory_space<vmem>>) attributes {dimension_semantics = [#tpu.dimension_semantics<parallel>, #tpu.dimension_semantics<parallel>], iteration_bounds = array<i64: 1, 1>, scalar_prefetch = 0 : i64, scratch_operands = 0 : i64, tpu.core_type = #tpu.core_type<tc>, window_params = [{transform_indices = @transform_0, window_bounds = array<i64: 128, 512>}, {transform_indices = @transform_1, window_bounds = array<i64: 512, 128>}, {transform_indices = @transform_2, window_bounds = array<i64: 1, 128>}, {transform_indices = @transform_3, window_bounds = array<i64: 128, 128>}]} {
    %c0 = arith.constant 0 : index
    %c0_0 = arith.constant 0 : index
    %0 = vector.load %arg2[%c0, %c0_0] : memref<128x512xbf16, #tpu.memory_space<vmem>>, vector<128x512xbf16>
    %c0_1 = arith.constant 0 : index
    %c0_2 = arith.constant 0 : index
    %1 = vector.load %arg3[%c0_1, %c0_2] : memref<512x128xbf16, #tpu.memory_space<vmem>>, vector<512x128xbf16>
    %cst = arith.constant dense<0.000000e+00> : vector<128x128xf32>
    %2 = tpu.matmul %0, %1, %cst {dimension_numbers = #tpu.dot_dimension_numbers<[1], [0], [0], [1], [0, 0, 1, 1], [], []>} : vector<128x512xbf16>, vector<512x128xbf16>, vector<128x128xf32> -> vector<128x128xf32>
    %c0_3 = arith.constant 0 : index
    %c0_4 = arith.constant 0 : index
    %3 = vector.load %arg4[%c0_3, %c0_4] : memref<1x128xf32, #tpu.memory_space<vmem>>, vector<1x128xf32>
    %4 = vector.broadcast %3 : vector<1x128xf32> to vector<128x128xf32>
    %5 = arith.addf %2, %4 : vector<128x128xf32>
    %c0_5 = arith.constant 0 : index
    %c0_6 = arith.constant 0 : index
    %6 = vector.load %arg5[%c0_5, %c0_6] : memref<128x128xf32, #tpu.memory_space<vmem>>, vector<128x128xf32>
    tpu.vector_store %arg5[%c0_5, %c0_6], %5 {strides = array<i32>} : memref<128x128xf32, #tpu.memory_space<vmem>>, vector<128x128xf32>,
    return
  }
  func.func @transform_0(%arg0: i32, %arg1: i32) -> (i32, i32) {
    %c0_i32 = arith.constant 0 : i32
    %c0_i32_0 = arith.constant 0 : i32
    return %arg0, %c0_i32 : i32, i32
  }
  func.func @transform_1(%arg0: i32, %arg1: i32) -> (i32, i32) {
    %c0_i32 = arith.constant 0 : i32
    %c0_i32_0 = arith.constant 0 : i32
    return %c0_i32, %arg1 : i32, i32
  }
  func.func @transform_2(%arg0: i32, %arg1: i32) -> (i32, i32) {
    %c0_i32 = arith.constant 0 : i32
    %c0_i32_0 = arith.constant 0 : i32
    return %c0_i32, %arg1 : i32, i32
  }
  func.func @transform_3(%arg0: i32, %arg1: i32) -> (i32, i32) {
    %c0_i32 = arith.constant 0 : i32
    return %arg0, %arg1 : i32, i32
  }
}

</mosaic_0001>

<bundles_post_ra>
// kernel: _classifier_forward.1
= control target key start
LH: loop header
LB: loop body
LE: loop exit
PB: predicated region body
PF: predicated region fallthrough
CT: control target
= control target key end

     0   :  { %s1238_s1 = inlined_call_operand.vmem [shape: bf16[512,128], index: 1, kind: input, shape index: {}]   ;;  %s1239_s0 = inlined_call_operand.vmem [shape: bf16[128,512], index: 0, kind: input, shape index: {}]   ;;  %s1240_s2 = inlined_call_operand.vmem [shape: f32[1,128], index: 2, kind: input, shape index: {}]   ;;  %s1241_s3 = inlined_call_operand.vmem [shape: f32[128,128], index: 3, kind: output, shape index: {}]  }
   0x1   :  { %v877_v0 = vld [vmem:[%s1238_s1 + $0x40] sm:$0xff]   ;;  %v881_v4 = vld [vmem:[%s1238_s1 + $0x48] sm:$0xff]   ;;  %v885_v8 = vld [vmem:[%s1238_s1 + $0x50] sm:$0xff]  }
   0x2   :  { %v878_v1 = vld [vmem:[%s1238_s1 + $0xc0] sm:$0xff]   ;;  %749 = vmatprep.subr.bf16.mxu0 %v877_v0  ;;  %v882_v5 = vld [vmem:[%s1238_s1 + $0xc8] sm:$0xff]   ;;  %v886_v9 = vld [vmem:[%s1238_s1 + $0xd0] sm:$0xff]  }
   0x3   :  { %v879_v2 = vld [vmem:[%s1238_s1] sm:$0xff]   ;;  %813 = vmatprep.subr.bf16.mxu1 %v878_v1  ;;  %v883_v6 = vld [vmem:[%s1238_s1 + $0x8] sm:$0xff]   ;;  %v887_v10 = vld [vmem:[%s1238_s1 + $0x10] sm:$0xff]  }
   0x4   :  { %v880_v3 = vld [vmem:[%s1238_s1 + $0x80] sm:$0xff]   ;;  %750 = vmatpush3.bf16.msra.mxu0 %v879_v2  ;;  %v884_v7 = vld [vmem:[%s1238_s1 + $0x88] sm:$0xff]   ;;  %v888_v11 = vld [vmem:[%s1238_s1 + $0x90] sm:$0xff]  }
   0x5   :  { %814 = vmatpush3.bf16.msra.mxu1 %v880_v3  ;;  %751 = vmatprep.subr.bf16.mxu0 %v881_v4  ;;  %v889_v12 = vld [vmem:[%s1238_s1 + $0x58] sm:$0xff]   ;;  %v893_v16 = vld [vmem:[%s1238_s1 + $0x60] sm:$0xff]   ;;  %v897_v20 = vld [vmem:[%s1238_s1 + $0x68] sm:$0xff]  }
   0x6   :  { %815 = vmatprep.subr.bf16.mxu1 %v882_v5  ;;  %v890_v13 = vld [vmem:[%s1238_s1 + $0xd8] sm:$0xff]   ;;  %v894_v17 = vld [vmem:[%s1238_s1 + $0xe0] sm:$0xff]   ;;  %v898_v21 = vld [vmem:[%s1238_s1 + $0xe8] sm:$0xff]  }
   0x7   :  { %v891_v14 = vld [vmem:[%s1238_s1 + $0x18] sm:$0xff]   ;;  %v895_v18 = vld [vmem:[%s1238_s1 + $0x20] sm:$0xff]   ;;  %v899_v22 = vld [vmem:[%s1238_s1 + $0x28] sm:$0xff]  }
   0x8   :  { %752 = vmatpush3.bf16.msra.mxu0 %v883_v6  ;;  %v892_v15 = vld [vmem:[%s1238_s1 + $0x98] sm:$0xff]   ;;  %v896_v19 = vld [vmem:[%s1238_s1 + $0xa0] sm:$0xff]   ;;  %v900_v23 = vld [vmem:[%s1238_s1 + $0xa8] sm:$0xff]  }
   0x9   :  { %816 = vmatpush3.bf16.msra.mxu1 %v884_v7  ;;  %753 = vmatprep.subr.bf16.mxu0 %v885_v8  ;;  %v901_v24 = vld [vmem:[%s1238_s1 + $0x70] sm:$0xff]   ;;  %v905_v28 = vld [vmem:[%s1238_s1 + $0x78] sm:$0xff]   ;;  %v1172_v2 = vld [vmem:[%s1240_s2] ss:$0 sm:$0xff] }
   0xa   :  { %817 = vmatprep.subr.bf16.mxu1 %v886_v9  ;;  %v902_v25 = vld [vmem:[%s1238_s1 + $0xf0] sm:$0xff]   ;;  %v906_v29 = vld [vmem:[%s1238_s1 + $0xf8] sm:$0xff]  }
   0xb   :  { %v903_v26 = vld [vmem:[%s1238_s1 + $0x30] sm:$0xff]   ;;  %v907_v30 = vld [vmem:[%s1238_s1 + $0x38] sm:$0xff]  }
   0xc   :  { %754 = vmatpush3.bf16.msra.mxu0 %v887_v10  ;;  %v904_v27 = vld [vmem:[%s1238_s1 + $0xb0] sm:$0xff]   ;;  %v908_v31 = vld [vmem:[%s1238_s1 + $0xb8] sm:$0xff]  }
   0xd   :  { %818 = vmatpush3.bf16.msra.mxu1 %v888_v11  ;;  %755 = vmatprep.subr.bf16.mxu0 %v889_v12  ;;  %v909_v32 = vld [vmem:[%s1239_s0] ss:$16 sps:$4 sm:$0xff]   ;;  %v911_v33 = vld [vmem:[%s1239_s0 + $0x4] ss:$16 sps:$4 sm:$0xff]   ;;  %v912_v34 = vld [vmem:[%s1239_s0 + $0x8] ss:$16 sps:$4 sm:$0xff]  }
   0xe   :  { %819 = vmatprep.subr.bf16.mxu1 %v890_v13  ;;  %v914_v35 = vld [vmem:[%s1239_s0 + $0xc] ss:$16 sps:$4 sm:$0xff]   ;;  %502 = vmatprep.mubr.bf16.mxu0 %v911_v33  ;;  %v915_v36 = vld [vmem:[%s1239_s0 + $0x24] ss:$16 sps:$4 sm:$0xff]   ;;  %v919_v38 = vld [vmem:[%s1239_s0 + $0x20] ss:$16 sps:$4 sm:$0xff]  }
   0xf   :  { %599 = vmatprep.mubr.bf16.mxu1 %v914_v35  ;;  %v917_v37 = vld [vmem:[%s1239_s0 + $0x2c] ss:$16 sps:$4 sm:$0xff]   ;;  %v920_v39 = vld [vmem:[%s1239_s0 + $0x28] ss:$16 sps:$4 sm:$0xff]   ;;  %v921_v40 = vld [vmem:[%s1239_s0 + $0x44] ss:$16 sps:$4 sm:$0xff]  }
  0x10   :  { %756 = vmatpush3.bf16.msra.mxu0 %v891_v14  ;;  %v923_v41 = vld [vmem:[%s1239_s0 + $0x4c] ss:$16 sps:$4 sm:$0xff]   ;;  %v925_v42 = vld [vmem:[%s1239_s0 + $0x40] ss:$16 sps:$4 sm:$0xff]   ;;  %v926_v43 = vld [vmem:[%s1239_s0 + $0x48] ss:$16 sps:$4 sm:$0xff]  }
  0x11   :  { %820 = vmatpush3.bf16.msra.mxu1 %v892_v15  ;;  %757 = vmatprep.subr.bf16.mxu0 %v893_v16  ;;  %v927_v44 = vld [vmem:[%s1239_s0 + $0x64] ss:$16 sps:$4 sm:$0xff]   ;;  %v929_v45 = vld [vmem:[%s1239_s0 + $0x6c] ss:$16 sps:$4 sm:$0xff]   ;;  %v931_v46 = vld [vmem:[%s1239_s0 + $0x60] ss:$16 sps:$4 sm:$0xff]  }
  0x12   :  { %821 = vmatprep.subr.bf16.mxu1 %v894_v17  ;;  %v932_v47 = vld [vmem:[%s1239_s0 + $0x68] ss:$16 sps:$4 sm:$0xff]   ;;  %v933_v48 = vld [vmem:[%s1239_s0 + $0x84] ss:$16 sps:$4 sm:$0xff]   ;;  %v935_v49 = vld [vmem:[%s1239_s0 + $0x8c] ss:$16 sps:$4 sm:$0xff]  }
  0x13   :  { %v937_v50 = vld [vmem:[%s1239_s0 + $0x80] ss:$16 sps:$4 sm:$0xff]   ;;  %v938_v51 = vld [vmem:[%s1239_s0 + $0x88] ss:$16 sps:$4 sm:$0xff]   ;;  %v939_v52 = vld [vmem:[%s1239_s0 + $0xa4] ss:$16 sps:$4 sm:$0xff]  }
  0x14   :  { %758 = vmatpush3.bf16.msra.mxu0 %v895_v18  ;;  %v941_v53 = vld [vmem:[%s1239_s0 + $0xac] ss:$16 sps:$4 sm:$0xff]   ;;  %v943_v54 = vld [vmem:[%s1239_s0 + $0xa0] ss:$16 sps:$4 sm:$0xff]   ;;  %v944_v55 = vld [vmem:[%s1239_s0 + $0xa8] ss:$16 sps:$4 sm:$0xff]  }
  0x15   :  { %822 = vmatpush3.bf16.msra.mxu1 %v896_v19  ;;  %759 = vmatprep.subr.bf16.mxu0 %v897_v20  ;;  %v945_v56 = vld [vmem:[%s1239_s0 + $0xc4] ss:$16 sps:$4 sm:$0xff]   ;;  %v947_v57 = vld [vmem:[%s1239_s0 + $0xcc] ss:$16 sps:$4 sm:$0xff]   ;;  %v949_v58 = vld [vmem:[%s1239_s0 + $0xc0] ss:$16 sps:$4 sm:$0xff]  }
  0x16   :  { %823 = vmatprep.subr.bf16.mxu1 %v898_v21  ;;  %v950_v59 = vld [vmem:[%s1239_s0 + $0xc8] ss:$16 sps:$4 sm:$0xff]   ;;  %v951_v60 = vld [vmem:[%s1239_s0 + $0xe4] ss:$16 sps:$4 sm:$0xff]   ;;  %v953_v61 = vld [vmem:[%s1239_s0 + $0xec] ss:$16 sps:$4 sm:$0xff]  }
  0x17   :  { %v955_v62 = vld [vmem:[%s1239_s0 + $0xe0] ss:$16 sps:$4 sm:$0xff]   ;;  %v956_v63 = vld [vmem:[%s1239_s0 + $0xe8] ss:$16 sps:$4 sm:$0xff]  }
  0x18   :  { %760 = vmatpush3.bf16.msra.mxu0 %v899_v22 }
  0x19   :  { %824 = vmatpush3.bf16.msra.mxu1 %v900_v23  ;;  %761 = vmatprep.subr.bf16.mxu0 %v901_v24 }
  0x1a   :  { %825 = vmatprep.subr.bf16.mxu1 %v902_v25 }
  0x1c   :  { %762 = vmatpush3.bf16.msra.mxu0 %v903_v26 }
  0x1d   :  { %826 = vmatpush3.bf16.msra.mxu1 %v904_v27  ;;  %763 = vmatprep.subr.bf16.mxu0 %v905_v28 }
  0x1e   :  { %827 = vmatprep.subr.bf16.mxu1 %v906_v29 }
  0x20   :  { %764 = vmatpush3.bf16.msra.mxu0 %v907_v30 }
  0x21   :  { %828 = vmatpush3.bf16.msra.mxu1 %v908_v31 }
  0x23   :  { %503 = vmatmul.mubr.bf16.vlgmr.msra.gmra.mrb[0].mxu0 %v909_v32 }
  0x24   :  { %600 = vmatmul.mubr.bf16.vlgmr.msra.gmra.mrb[0].mxu1 %v912_v34  ;;  %510 = vmatprep.mubr.bf16.mxu0 %v915_v36 }
  0x25   :  { %607 = vmatprep.mubr.bf16.mxu1 %v917_v37 }
  0x2b   :  { %511 = vmatmul.mubr.bf16.gmra.mrb[4].mxu0 %v919_v38 }
  0x2c   :  { %608 = vmatmul.mubr.bf16.gmra.mrb[4].mxu1 %v920_v39  ;;  %518 = vmatprep.mubr.bf16.mxu0 %v921_v40 }
  0x2d   :  { %615 = vmatprep.mubr.bf16.mxu1 %v923_v41 }
  0x33   :  { %519 = vmatmul.mubr.bf16.gmra.mrb[8].mxu0 %v925_v42 }
  0x34   :  { %616 = vmatmul.mubr.bf16.gmra.mrb[8].mxu1 %v926_v43  ;;  %526 = vmatprep.mubr.bf16.mxu0 %v927_v44 }
  0x35   :  { %623 = vmatprep.mubr.bf16.mxu1 %v929_v45 }
  0x3b   :  { %527 = vmatmul.mubr.bf16.gmra.mrb[12].mxu0 %v931_v46 }
  0x3c   :  { %624 = vmatmul.mubr.bf16.gmra.mrb[12].mxu1 %v932_v47  ;;  %534 = vmatprep.mubr.bf16.mxu0 %v933_v48 }
  0x3d   :  { %631 = vmatprep.mubr.bf16.mxu1 %v935_v49 }
  0x43   :  { %535 = vmatmul.mubr.bf16.gmra.mrb[16].mxu0 %v937_v50 }
  0x44   :  { %632 = vmatmul.mubr.bf16.gmra.mrb[16].mxu1 %v938_v51  ;;  %542 = vmatprep.mubr.bf16.mxu0 %v939_v52 }
  0x45   :  { %639 = vmatprep.mubr.bf16.mxu1 %v941_v53 }
  0x4b   :  { %543 = vmatmul.mubr.bf16.gmra.mrb[20].mxu0 %v943_v54 }
  0x4c   :  { %640 = vmatmul.mubr.bf16.gmra.mrb[20].mxu1 %v944_v55  ;;  %550 = vmatprep.mubr.bf16.mxu0 %v945_v56 }
  0x4d   :  { %647 = vmatprep.mubr.bf16.mxu1 %v947_v57 }
  0x53   :  { %551 = vmatmul.mubr.bf16.gmra.mrb[24].mxu0 %v949_v58 }
  0x54   :  { %648 = vmatmul.mubr.bf16.gmra.mrb[24].mxu1 %v950_v59  ;;  %558 = vmatprep.mubr.bf16.mxu0 %v951_v60 }
  0x55   :  { %655 = vmatprep.mubr.bf16.mxu1 %v953_v61 }
  0x5b   :  { %559 = vmatmul.mubr.bf16.gmra.mrb[28].mxu0 %v955_v62 }
  0x5c   :  { %656 = vmatmul.mubr.bf16.gmra.mrb[28].mxu1 %v956_v63 }
  0xf6   :  { %v765_v0 = vpop.f32.mrb[0].mxu0 }
  0xf7   :  { %v829_v1 = vpop.f32.mrb[0].mxu1  ;;  %v766_v3 = vpop.f32.mrb[1].mxu0 }
  0xf8   :  { %v767_v4 = vadd.f32 %v766_v3, %v765_v0  ;;  %v830_v5 = vpop.f32.mrb[1].mxu1  ;;  %v768_v6 = vpop.f32.mrb[2].mxu0 }
  0xf9   :  { %v831_v7 = vadd.f32 %v830_v5, %v829_v1  ;;  %v832_v8 = vpop.f32.mrb[2].mxu1  ;;  %v769_v9 = vpop.f32.mrb[3].mxu0 }
  0xfa   :  { %v505_v10 = vadd.f32 %v767_v4, %v1172_v2  ;;  %v770_v11 = vadd.f32 %v769_v9, %v768_v6  ;;  %v833_v12 = vpop.f32.mrb[3].mxu1 }
  0xfb   :  { %v834_v13 = vadd.f32 %v833_v12, %v832_v8 }
  0xfc   :  { %v602_v14 = vadd.f32 %v831_v7, %v505_v10  ;;  %v508_v15 = vadd.f32 %v770_v11, %v1172_v2 }
  0xfe   :  { %664 = vst [vmem:[%s1241_s3] sm:$0xff] %v602_v14  ;;  %v605_v16 = vadd.f32 %v834_v13, %v508_v15  ;;  %v771_v17 = vpop.f32.mrb[4].mxu0 }
  0xff   :  { %v835_v18 = vpop.f32.mrb[4].mxu1  ;;  %v772_v19 = vpop.f32.mrb[5].mxu0 }
 0x100   :  { %665 = vst [vmem:[%s1241_s3 + $0x8] sm:$0xff] %v605_v16  ;;  %v773_v20 = vadd.f32 %v772_v19, %v771_v17  ;;  %v836_v21 = vpop.f32.mrb[5].mxu1  ;;  %v774_v22 = vpop.f32.mrb[6].mxu0 }
 0x101   :  { %v837_v23 = vadd.f32 %v836_v21, %v835_v18  ;;  %v838_v24 = vpop.f32.mrb[6].mxu1  ;;  %v775_v25 = vpop.f32.mrb[7].mxu0 }
 0x102   :  { %v513_v26 = vadd.f32 %v773_v20, %v1172_v2  ;;  %v776_v27 = vadd.f32 %v775_v25, %v774_v22  ;;  %v839_v28 = vpop.f32.mrb[7].mxu1 }
 0x103   :  { %v840_v29 = vadd.f32 %v839_v28, %v838_v24 }
 0x104   :  { %v610_v30 = vadd.f32 %v837_v23, %v513_v26  ;;  %v516_v31 = vadd.f32 %v776_v27, %v1172_v2 }
 0x106   :  { %666 = vst [vmem:[%s1241_s3 + $0x10] sm:$0xff] %v610_v30  ;;  %v613_v32 = vadd.f32 %v840_v29, %v516_v31  ;;  %v777_v33 = vpop.f32.mrb[8].mxu0 }
 0x107   :  { %v841_v34 = vpop.f32.mrb[8].mxu1  ;;  %v778_v35 = vpop.f32.mrb[9].mxu0 }
 0x108   :  { %667 = vst [vmem:[%s1241_s3 + $0x18] sm:$0xff] %v613_v32  ;;  %v779_v36 = vadd.f32 %v778_v35, %v777_v33  ;;  %v842_v37 = vpop.f32.mrb[9].mxu1  ;;  %v780_v38 = vpop.f32.mrb[10].mxu0 }
 0x109   :  { %v843_v39 = vadd.f32 %v842_v37, %v841_v34  ;;  %v844_v40 = vpop.f32.mrb[10].mxu1  ;;  %v781_v41 = vpop.f32.mrb[11].mxu0 }
 0x10a   :  { %v521_v42 = vadd.f32 %v779_v36, %v1172_v2  ;;  %v782_v43 = vadd.f32 %v781_v41, %v780_v38  ;;  %v845_v44 = vpop.f32.mrb[11].mxu1 }
 0x10b   :  { %v846_v45 = vadd.f32 %v845_v44, %v844_v40 }
 0x10c   :  { %v618_v46 = vadd.f32 %v843_v39, %v521_v42  ;;  %v524_v47 = vadd.f32 %v782_v43, %v1172_v2 }
 0x10e   :  { %668 = vst [vmem:[%s1241_s3 + $0x20] sm:$0xff] %v618_v46  ;;  %v621_v48 = vadd.f32 %v846_v45, %v524_v47  ;;  %v783_v49 = vpop.f32.mrb[12].mxu0 }
 0x10f   :  { %v847_v50 = vpop.f32.mrb[12].mxu1  ;;  %v784_v51 = vpop.f32.mrb[13].mxu0 }
 0x110   :  { %669 = vst [vmem:[%s1241_s3 + $0x28] sm:$0xff] %v621_v48  ;;  %v785_v52 = vadd.f32 %v784_v51, %v783_v49  ;;  %v848_v53 = vpop.f32.mrb[13].mxu1  ;;  %v786_v54 = vpop.f32.mrb[14].mxu0 }
 0x111   :  { %v849_v55 = vadd.f32 %v848_v53, %v847_v50  ;;  %v850_v56 = vpop.f32.mrb[14].mxu1  ;;  %v787_v57 = vpop.f32.mrb[15].mxu0 }
 0x112   :  { %v529_v58 = vadd.f32 %v785_v52, %v1172_v2  ;;  %v788_v59 = vadd.f32 %v787_v57, %v786_v54  ;;  %v851_v60 = vpop.f32.mrb[15].mxu1 }
 0x113   :  { %v852_v61 = vadd.f32 %v851_v60, %v850_v56 }
 0x114   :  { %v626_v62 = vadd.f32 %v849_v55, %v529_v58  ;;  %v532_v63 = vadd.f32 %v788_v59, %v1172_v2 }
 0x116   :  { %670 = vst [vmem:[%s1241_s3 + $0x30] sm:$0xff] %v626_v62  ;;  %v629_v0 = vadd.f32 %v852_v61, %v532_v63  ;;  %v789_v1 = vpop.f32.mrb[16].mxu0 }
 0x117   :  { %v853_v3 = vpop.f32.mrb[16].mxu1  ;;  %v790_v4 = vpop.f32.mrb[17].mxu0 }
 0x118   :  { %671 = vst [vmem:[%s1241_s3 + $0x38] sm:$0xff] %v629_v0  ;;  %v791_v5 = vadd.f32 %v790_v4, %v789_v1  ;;  %v854_v6 = vpop.f32.mrb[17].mxu1  ;;  %v792_v7 = vpop.f32.mrb[18].mxu0 }
 0x119   :  { %v855_v8 = vadd.f32 %v854_v6, %v853_v3  ;;  %v856_v9 = vpop.f32.mrb[18].mxu1  ;;  %v793_v10 = vpop.f32.mrb[19].mxu0 }
 0x11a   :  { %v537_v11 = vadd.f32 %v791_v5, %v1172_v2  ;;  %v794_v12 = vadd.f32 %v793_v10, %v792_v7  ;;  %v857_v13 = vpop.f32.mrb[19].mxu1 }
 0x11b   :  { %v858_v14 = vadd.f32 %v857_v13, %v856_v9 }
 0x11c   :  { %v634_v15 = vadd.f32 %v855_v8, %v537_v11  ;;  %v540_v16 = vadd.f32 %v794_v12, %v1172_v2 }
 0x11e   :  { %672 = vst [vmem:[%s1241_s3 + $0x40] sm:$0xff] %v634_v15  ;;  %v637_v17 = vadd.f32 %v858_v14, %v540_v16  ;;  %v795_v18 = vpop.f32.mrb[20].mxu0 }
 0x11f   :  { %v859_v19 = vpop.f32.mrb[20].mxu1  ;;  %v796_v20 = vpop.f32.mrb[21].mxu0 }
 0x120   :  { %673 = vst [vmem:[%s1241_s3 + $0x48] sm:$0xff] %v637_v17  ;;  %v797_v21 = vadd.f32 %v796_v20, %v795_v18  ;;  %v860_v22 = vpop.f32.mrb[21].mxu1  ;;  %v798_v23 = vpop.f32.mrb[22].mxu0 }
 0x121   :  { %v861_v24 = vadd.f32 %v860_v22, %v859_v19  ;;  %v862_v25 = vpop.f32.mrb[22].mxu1  ;;  %v799_v26 = vpop.f32.mrb[23].mxu0 }
 0x122   :  { %v545_v27 = vadd.f32 %v797_v21, %v1172_v2  ;;  %v800_v28 = vadd.f32 %v799_v26, %v798_v23  ;;  %v863_v29 = vpop.f32.mrb[23].mxu1 }
 0x123   :  { %v864_v30 = vadd.f32 %v863_v29, %v862_v25 }
 0x124   :  { %v642_v31 = vadd.f32 %v861_v24, %v545_v27  ;;  %v548_v32 = vadd.f32 %v800_v28, %v1172_v2 }
 0x126   :  { %674 = vst [vmem:[%s1241_s3 + $0x50] sm:$0xff] %v642_v31  ;;  %v645_v33 = vadd.f32 %v864_v30, %v548_v32  ;;  %v801_v34 = vpop.f32.mrb[24].mxu0 }
 0x127   :  { %v865_v35 = vpop.f32.mrb[24].mxu1  ;;  %v802_v36 = vpop.f32.mrb[25].mxu0 }
 0x128   :  { %675 = vst [vmem:[%s1241_s3 + $0x58] sm:$0xff] %v645_v33  ;;  %v803_v37 = vadd.f32 %v802_v36, %v801_v34  ;;  %v866_v38 = vpop.f32.mrb[25].mxu1  ;;  %v804_v39 = vpop.f32.mrb[26].mxu0 }
 0x129   :  { %v867_v40 = vadd.f32 %v866_v38, %v865_v35  ;;  %v868_v41 = vpop.f32.mrb[26].mxu1  ;;  %v805_v42 = vpop.f32.mrb[27].mxu0 }
 0x12a   :  { %v553_v43 = vadd.f32 %v803_v37, %v1172_v2  ;;  %v806_v44 = vadd.f32 %v805_v42, %v804_v39  ;;  %v869_v45 = vpop.f32.mrb[27].mxu1 }
 0x12b   :  { %v870_v46 = vadd.f32 %v869_v45, %v868_v41 }
 0x12c   :  { %v650_v47 = vadd.f32 %v867_v40, %v553_v43  ;;  %v556_v48 = vadd.f32 %v806_v44, %v1172_v2 }
 0x12e   :  { %676 = vst [vmem:[%s1241_s3 + $0x60] sm:$0xff] %v650_v47  ;;  %v653_v49 = vadd.f32 %v870_v46, %v556_v48  ;;  %v807_v50 = vpop.f32.mrb[28].mxu0 }
 0x12f   :  { %v871_v51 = vpop.f32.mrb[28].mxu1  ;;  %v808_v52 = vpop.f32.mrb[29].mxu0 }
 0x130   :  { %677 = vst [vmem:[%s1241_s3 + $0x68] sm:$0xff] %v653_v49  ;;  %v809_v53 = vadd.f32 %v808_v52, %v807_v50  ;;  %v872_v54 = vpop.f32.mrb[29].mxu1  ;;  %v810_v55 = vpop.f32.mrb[30].mxu0 }
 0x131   :  { %v873_v56 = vadd.f32 %v872_v54, %v871_v51  ;;  %v874_v57 = vpop.f32.mrb[30].mxu1  ;;  %v811_v58 = vpop.f32.mrb[31].mxu0 }
 0x132   :  { %v561_v59 = vadd.f32 %v809_v53, %v1172_v2  ;;  %v812_v60 = vadd.f32 %v811_v58, %v810_v55  ;;  %v875_v61 = vpop.f32.mrb[31].mxu1 }
 0x133   :  { %v876_v62 = vadd.f32 %v875_v61, %v874_v57 }
 0x134   :  { %v658_v63 = vadd.f32 %v873_v56, %v561_v59  ;;  %v564_v0 = vadd.f32 %v812_v60, %v1172_v2 }
 0x136   :  { %678 = vst [vmem:[%s1241_s3 + $0x70] sm:$0xff] %v658_v63  ;;  %v661_v1 = vadd.f32 %v876_v62, %v564_v0 }
 0x138   :  { %679 = vst [vmem:[%s1241_s3 + $0x78] sm:$0xff] %v661_v1 }

</bundles_post_ra>
